<compile_context>
chip_gen: v6e
topology: v6e:2x2x1
jax: 0.10.0
libtpu: 0.0.40
codegen_flags: <defaults>
</compile_context>

<pallas_src>
import functools

import jax
import jax.numpy as jnp
from jax.experimental import pallas as pl
from jax.experimental.pallas import tpu as pltpu


def _round_up(x: int, m: int) -> int:
    return -(-x // m) * m


def _ce_kernel(lbl_ref, *refs, ignore_label: int, weights: tuple):
    """Grid step (n, p, i): (1, C, S, 128) block per head + (1, 1, S, 128) labels.

    Accumulates the weight-fused per-pixel NLL and the valid-pixel count into
    (S, 128) f32 VMEM scratch; reduces to the per-(batch, slice) scalar output
    only in the last-tile epilogue.
    """
    num_heads = len(weights)
    x_refs = refs[:num_heads]
    loss_ref = refs[num_heads]
    cnt_ref = refs[num_heads + 1]
    loss_acc = refs[num_heads + 2]
    cnt_acc = refs[num_heads + 3]

    i = pl.program_id(2)

    @pl.when(i == 0)
    def _init():
        loss_acc[...] = jnp.zeros_like(loss_acc)
        cnt_acc[...] = jnp.zeros_like(cnt_acc)

    lbl = lbl_ref[...]                               # (1, 1, S, 128) int32
    # Host-side padding uses ignore_label, so this single compare also drops
    # the padded pixels — no per-tile in-bounds iota needed.
    valid = lbl != ignore_label                      # (1, 1, S, 128) bool

    # Head-invariant one-hot over the class axis (hoisted out of the head loop;
    # JAX does not CSE iota/broadcast, so doing this inside the loop would emit
    # it once per head).
    cls = jax.lax.broadcasted_iota(jnp.int32, x_refs[0].shape, 1)  # (1, C, S, 128)
    onehot = cls == lbl                              # broadcasts over class planes

    nll_w = jnp.zeros(lbl.shape, jnp.float32)
    for h in range(num_heads):
        x = x_refs[h][...]                           # (1, C, S, 128), native dtype
        # Cross-class reductions are over the leading axis => plain VPU work on
        # dense (S, 128) planes (no XLU sublane reduce).
        m = jnp.max(x, axis=1, keepdims=True)        # (1, 1, S, 128)
        xm = (x - m).astype(jnp.float32)             # promote only for exp/log/acc
        lse = jnp.log(jnp.sum(jnp.exp(xm), axis=1, keepdims=True))
        picked = jnp.sum(jnp.where(onehot, xm, 0.0), axis=1, keepdims=True)
        # m cancels: (m + lse) - (m + picked_abs) == lse - picked
        nll_w = nll_w + jnp.float32(weights[h]) * (lse - picked)

    # Select AFTER compute so ignored / padded pixels can never propagate junk.
    nll_w = jnp.where(valid, nll_w, 0.0)

    loss_acc[...] = loss_acc[...] + nll_w[0, 0]                      # (S, 128)
    cnt_acc[...] = cnt_acc[...] + valid[0, 0].astype(jnp.float32)

    @pl.when(i == pl.num_programs(2) - 1)
    def _finalize():
        loss_ref[...] = jnp.sum(loss_acc[...]).reshape(1, 1, 1, 1)
        cnt_ref[...] = jnp.sum(cnt_acc[...]).reshape(1, 1, 1, 1)


def _choose_tile(hw: int, c: int, num_heads: int, itemsize: int) -> int:
    """Largest pixel tile (multiple of 128) whose double-buffered blocks fit VMEM.

    ~16 MiB block budget: large enough to sit near the HBM roofline on
    v5e/v6e, safe under v7x's 64 MiB physical VMEM (paired with a 32 MiB
    vmem_limit_bytes).  Tiles smaller than the full pixel extent are kept a
    multiple of 1024 pixels so the sublane-block dimension stays 8-aligned.
    """
    vmem_budget = 16 * 1024 * 1024
    # double-buffered inputs (heads * logits + int32 labels) + 2 f32 scratch rows
    per_pixel = 2 * (num_heads * c * itemsize + 4) + 8
    max_tile = max(1024, vmem_budget // per_pixel)
    max_tile = min(max_tile, 16384)
    if hw <= max_tile:
        return _round_up(hw, 128)          # single tile: block == padded array extent
    return (max_tile // 1024) * 1024       # 8-sublane-aligned blocks


def cross_entropy_2d(preds, labels, weights, ignore_label: int = 255, tile=None):
    """Aux-weighted sum of CrossEntropyLoss(ignore_index, 'mean') on NCHW heads."""
    preds = tuple(preds)
    weights = tuple(float(w) for w in weights)
    assert len(preds) == len(weights) and len(preds) >= 1
    assert all(p.shape == preds[0].shape for p in preds), "heads must share shape"

    n, c, h, w = preds[0].shape
    hw = h * w

    itemsize = max(jnp.dtype(p.dtype).itemsize for p in preds)
    if tile is None:
        tile = _choose_tile(hw, c, len(preds), itemsize)
    assert tile % 128 == 0

    # Second "parallel" grid axis so both v7x TensorCores stay busy when N == 1
    # (no effect on single-TC v5e/v6e).
    p_split = 2 if (n == 1 and hw > tile) else 1

    # Pad the pixel axis to a whole number of tiles per parallel slice.
    hw_pad = _round_up(hw, tile * p_split)

    xs = [p.reshape(n, c, hw) for p in preds]        # free reshape of NCHW
    y = labels.reshape(n, 1, hw).astype(jnp.int32)
    if hw_pad != hw:
        pad = hw_pad - hw
        xs = [jnp.pad(x, ((0, 0), (0, 0), (0, pad))) for x in xs]         # zeros
        y = jnp.pad(y, ((0, 0), (0, 0), (0, pad)), constant_values=ignore_label)

    sb = hw_pad // 128                               # 128-lane pixel blocks
    xs = [x.reshape(n, c, sb, 128) for x in xs]
    y = y.reshape(n, 1, sb, 128)

    s = tile // 128                                  # sublane-blocks per pixel tile
    tiles_per_p = sb // (s * p_split)

    kernel = functools.partial(
        _ce_kernel, ignore_label=int(ignore_label), weights=weights)

    def pix_map(bn, p, bi):
        return (bn, 0, p * tiles_per_p + bi, 0)

    in_specs = [pl.BlockSpec((1, 1, s, 128), pix_map)]
    in_specs += [pl.BlockSpec((1, c, s, 128), pix_map) for _ in preds]

    out_map = lambda bn, p, bi: (bn, p, 0, 0)

    loss_p, cnt_p = pl.pallas_call(
        kernel,
        grid=(n, p_split, tiles_per_p),
        in_specs=in_specs,
        out_specs=[pl.BlockSpec((1, 1, 1, 1), out_map),
                   pl.BlockSpec((1, 1, 1, 1), out_map)],
        out_shape=[jax.ShapeDtypeStruct((n, p_split, 1, 1), jnp.float32),
                   jax.ShapeDtypeStruct((n, p_split, 1, 1), jnp.float32)],
        scratch_shapes=[pltpu.VMEM((s, 128), jnp.float32),
                        pltpu.VMEM((s, 128), jnp.float32)],
        compiler_params=pltpu.CompilerParams(
            dimension_semantics=("parallel", "parallel", "arbitrary"),
            vmem_limit_bytes=32 * 1024 * 1024),
    )(y, *xs)

    # reduction='mean' over non-ignored pixels.  If every pixel is ignored this
    # is 0/0 = NaN, matching PyTorch.
    return jnp.sum(loss_p) / jnp.sum(cnt_p)


class CrossEntropy:
    """JAX/Pallas port of semseg.losses.CrossEntropy."""

    def __init__(self, ignore_label: int = 255, weight=None,
                 aux_weights: list = [1, 0.4, 0.4]) -> None:
        self.ignore_label = ignore_label
        self.aux_weights = aux_weights
        # TODO(synk): per-class `weight` tensor not implemented (reference default is None)
        assert weight is None, "per-class weight not supported in this kernel"

    def __call__(self, preds, labels):
        if isinstance(preds, tuple):
            pairs = list(zip(preds, self.aux_weights))   # zip semantics of the reference
            heads = tuple(p for p, _ in pairs)
            ws = tuple(w for _, w in pairs)
            return cross_entropy_2d(heads, labels, ws, ignore_label=self.ignore_label)
        return cross_entropy_2d((preds,), labels, (1.0,),
                                ignore_label=self.ignore_label)


if __name__ == "__main__":
    key = jax.random.PRNGKey(0)
    k1, k2, k3, k4, k5 = jax.random.split(key, 5)

    N, C, H, W = 2, 4, 16, 16

    # main prediction + two auxiliary heads (tuple path of forward)
    pred0 = jax.random.normal(k1, (N, C, H, W), dtype=jnp.float32)
    pred1 = jax.random.normal(k2, (N, C, H, W), dtype=jnp.float32)
    pred2 = jax.random.normal(k3, (N, C, H, W), dtype=jnp.float32)

    labels = jax.random.randint(k4, (N, H, W), 0, C, dtype=jnp.int32)
    # sprinkle some ignore_label=255 pixels
    ignore_mask = jax.random.uniform(k5, (N, H, W)) < 0.1
    labels = jnp.where(ignore_mask, 255, labels)

    loss_fn = CrossEntropy(ignore_label=255, weight=None, aux_weights=[1, 0.4, 0.4])

    loss_tuple = loss_fn((pred0, pred1, pred2), labels)   # tuple (aux-weighted) path
    loss_single = loss_fn(pred0, labels)                  # single-tensor path
    jax.block_until_ready(loss_tuple)
    jax.block_until_ready(loss_single)

    # pure-JAX reference for a sanity check
    def ref_ce(p, lab, ignore=255):
        nclass = p.shape[1]
        x = jnp.transpose(p, (0, 2, 3, 1)).reshape(-1, nclass).astype(jnp.float32)
        yy = lab.reshape(-1)
        valid = yy != ignore
        ys = jnp.where(valid, yy, 0)
        logp = jax.nn.log_softmax(x, axis=-1)
        nll = -jnp.take_along_axis(logp, ys[:, None], axis=-1)[:, 0]
        nll = jnp.where(valid, nll, 0.0)
        return jnp.sum(nll) / jnp.sum(valid.astype(jnp.float32))

    ref_tuple = (1.0 * ref_ce(pred0, labels) + 0.4 * ref_ce(pred1, labels)
                 + 0.4 * ref_ce(pred2, labels))
    ref_single = ref_ce(pred0, labels)

    assert jnp.allclose(loss_tuple, ref_tuple, rtol=2e-3, atol=1e-5), (loss_tuple, ref_tuple)
    assert jnp.allclose(loss_single, ref_single, rtol=2e-3, atol=1e-5), (loss_single, ref_single)

    # ragged / N==1 path: exercises pixel-axis padding, the 2-way parallel
    # superblock split (v7x dual-TC) and multi-tile accumulation.
    N2, H2, W2 = 1, 48, 48
    predr = jax.random.normal(k1, (N2, C, H2, W2), dtype=jnp.float32)
    labr = jax.random.randint(k2, (N2, H2, W2), 0, C, dtype=jnp.int32)
    labr = jnp.where(jax.random.uniform(k3, (N2, H2, W2)) < 0.1, 255, labr)
    loss_r = cross_entropy_2d((predr,), labr, (1.0,), ignore_label=255, tile=1024)
    jax.block_until_ready(loss_r)
    ref_r = ref_ce(predr, labr)
    assert jnp.allclose(loss_r, ref_r, rtol=2e-3, atol=1e-5), (loss_r, ref_r)

    print("KERNEL_OK")
</pallas_src>

<mosaic_0001>
module attributes {stable_mosaic.version = 11 : i64} {
  func.func @_ce_kernel(%arg0: i32, %arg1: i32, %arg2: i32, %arg3: memref<1x1x2x128xi32, #tpu.memory_space<vmem>>, %arg4: memref<1x4x2x128xf32, #tpu.memory_space<vmem>>, %arg5: memref<1x4x2x128xf32, #tpu.memory_space<vmem>>, %arg6: memref<1x4x2x128xf32, #tpu.memory_space<vmem>>, %arg7: memref<1x1x1x1xf32, #tpu.memory_space<vmem>>, %arg8: memref<1x1x1x1xf32, #tpu.memory_space<vmem>>, %arg9: memref<2x128xf32, #tpu.memory_space<vmem>>, %arg10: memref<2x128xf32, #tpu.memory_space<vmem>>) attributes {dimension_semantics = [#tpu.dimension_semantics<parallel>, #tpu.dimension_semantics<parallel>, #tpu.dimension_semantics<arbitrary>], iteration_bounds = array<i64: 2, 1, 1>, scalar_prefetch = 0 : i64, scratch_operands = 2 : i64, tpu.core_type = #tpu.core_type<tc>, window_params = [{transform_indices = @transform_0, window_bounds = array<i64: 1, 1, 2, 128>}, {transform_indices = @transform_1, window_bounds = array<i64: 1, 4, 2, 128>}, {transform_indices = @transform_2, window_bounds = array<i64: 1, 4, 2, 128>}, {transform_indices = @transform_3, window_bounds = array<i64: 1, 4, 2, 128>}, {transform_indices = @transform_4, window_bounds = array<i64: 1, 1, 1, 1>}, {transform_indices = @transform_5, window_bounds = array<i64: 1, 1, 1, 1>}]} {
    %c0_i32 = arith.constant 0 : i32
    %0 = arith.cmpi eq, %arg2, %c0_i32 : i32
    %1 = arith.extui %0 : i1 to i32
    %c0_i32_0 = arith.constant 0 : i32
    %2 = arith.cmpi ne, %1, %c0_i32_0 : i32
    scf.if %2 {
      %cst_42 = arith.constant 0.000000e+00 : f32
      %76 = vector.broadcast %cst_42 : f32 to vector<2x128xf32>
      %c0_43 = arith.constant 0 : index
      %c0_44 = arith.constant 0 : index
      %77 = vector.load %arg9[%c0_43, %c0_44] : memref<2x128xf32, #tpu.memory_space<vmem>>, vector<2x128xf32>
      tpu.vector_store %arg9[%c0_43, %c0_44], %76 {strides = array<i32>} : memref<2x128xf32, #tpu.memory_space<vmem>>, vector<2x128xf32>,
      %cst_45 = arith.constant 0.000000e+00 : f32
      %78 = vector.broadcast %cst_45 : f32 to vector<2x128xf32>
      %c0_46 = arith.constant 0 : index
      %c0_47 = arith.constant 0 : index
      %79 = vector.load %arg10[%c0_46, %c0_47] : memref<2x128xf32, #tpu.memory_space<vmem>>, vector<2x128xf32>
      tpu.vector_store %arg10[%c0_46, %c0_47], %78 {strides = array<i32>} : memref<2x128xf32, #tpu.memory_space<vmem>>, vector<2x128xf32>,
    } else {
    }
    %c0 = arith.constant 0 : index
    %c0_1 = arith.constant 0 : index
    %c0_2 = arith.constant 0 : index
    %c0_3 = arith.constant 0 : index
    %3 = vector.load %arg3[%c0, %c0_1, %c0_2, %c0_3] : memref<1x1x2x128xi32, #tpu.memory_space<vmem>>, vector<1x1x2x128xi32>
    %c255_i32 = arith.constant 255 : i32
    %4 = vector.broadcast %c255_i32 : i32 to vector<1x1x2x128xi32>
    %5 = arith.cmpi ne, %3, %4 : vector<1x1x2x128xi32>
    %6 = tpu.iota {dimensions = array<i32: 1>} : vector<1x4x2x128xi32>
    %7 = vector.broadcast %3 : vector<1x1x2x128xi32> to vector<1x4x2x128xi32>
    %8 = arith.cmpi eq, %6, %7 : vector<1x4x2x128xi32>
    %cst = arith.constant 0.000000e+00 : f32
    %9 = vector.broadcast %cst : f32 to vector<1x1x2x128xf32>
    %c0_4 = arith.constant 0 : index
    %c0_5 = arith.constant 0 : index
    %c0_6 = arith.constant 0 : index
    %c0_7 = arith.constant 0 : index
    %10 = vector.load %arg4[%c0_4, %c0_5, %c0_6, %c0_7] : memref<1x4x2x128xf32, #tpu.memory_space<vmem>>, vector<1x4x2x128xf32>
    %cst_8 = arith.constant dense<0xFF800000> : vector<1x2x128xf32>
    %11 = vector.multi_reduction <maximumf>, %10, %cst_8 [1] : vector<1x4x2x128xf32> to vector<1x2x128xf32>
    %12 = vector.shape_cast %11 : vector<1x2x128xf32> to vector<1x1x2x128xf32>
    %13 = vector.broadcast %12 : vector<1x1x2x128xf32> to vector<1x4x2x128xf32>
    %14 = arith.subf %10, %13 : vector<1x4x2x128xf32>
    %15 = math.exp %14 : vector<1x4x2x128xf32>
    %cst_9 = arith.constant dense<0.000000e+00> : vector<1x2x128xf32>
    %16 = vector.multi_reduction <add>, %15, %cst_9 [1] : vector<1x4x2x128xf32> to vector<1x2x128xf32>
    %17 = vector.shape_cast %16 : vector<1x2x128xf32> to vector<1x1x2x128xf32>
    %18 = math.log %17 : vector<1x1x2x128xf32>
    %cst_10 = arith.constant 0.000000e+00 : f32
    %19 = vector.broadcast %cst_10 : f32 to vector<1x4x2x128xf32>
    %20 = arith.select %8, %14, %19 : vector<1x4x2x128xi1>, vector<1x4x2x128xf32>
    %cst_11 = arith.constant dense<0.000000e+00> : vector<1x2x128xf32>
    %21 = vector.multi_reduction <add>, %20, %cst_11 [1] : vector<1x4x2x128xf32> to vector<1x2x128xf32>
    %22 = vector.shape_cast %21 : vector<1x2x128xf32> to vector<1x1x2x128xf32>
    %23 = arith.subf %18, %22 : vector<1x1x2x128xf32>
    %cst_12 = arith.constant 1.000000e+00 : f32
    %24 = vector.broadcast %cst_12 : f32 to vector<1x1x2x128xf32>
    %25 = arith.mulf %24, %23 : vector<1x1x2x128xf32>
    %26 = arith.addf %9, %25 : vector<1x1x2x128xf32>
    %c0_13 = arith.constant 0 : index
    %c0_14 = arith.constant 0 : index
    %c0_15 = arith.constant 0 : index
    %c0_16 = arith.constant 0 : index
    %27 = vector.load %arg5[%c0_13, %c0_14, %c0_15, %c0_16] : memref<1x4x2x128xf32, #tpu.memory_space<vmem>>, vector<1x4x2x128xf32>
    %cst_17 = arith.constant dense<0xFF800000> : vector<1x2x128xf32>
    %28 = vector.multi_reduction <maximumf>, %27, %cst_17 [1] : vector<1x4x2x128xf32> to vector<1x2x128xf32>
    %29 = vector.shape_cast %28 : vector<1x2x128xf32> to vector<1x1x2x128xf32>
    %30 = vector.broadcast %29 : vector<1x1x2x128xf32> to vector<1x4x2x128xf32>
    %31 = arith.subf %27, %30 : vector<1x4x2x128xf32>
    %32 = math.exp %31 : vector<1x4x2x128xf32>
    %cst_18 = arith.constant dense<0.000000e+00> : vector<1x2x128xf32>
    %33 = vector.multi_reduction <add>, %32, %cst_18 [1] : vector<1x4x2x128xf32> to vector<1x2x128xf32>
    %34 = vector.shape_cast %33 : vector<1x2x128xf32> to vector<1x1x2x128xf32>
    %35 = math.log %34 : vector<1x1x2x128xf32>
    %cst_19 = arith.constant 0.000000e+00 : f32
    %36 = vector.broadcast %cst_19 : f32 to vector<1x4x2x128xf32>
    %37 = arith.select %8, %31, %36 : vector<1x4x2x128xi1>, vector<1x4x2x128xf32>
    %cst_20 = arith.constant dense<0.000000e+00> : vector<1x2x128xf32>
    %38 = vector.multi_reduction <add>, %37, %cst_20 [1] : vector<1x4x2x128xf32> to vector<1x2x128xf32>
    %39 = vector.shape_cast %38 : vector<1x2x128xf32> to vector<1x1x2x128xf32>
    %40 = arith.subf %35, %39 : vector<1x1x2x128xf32>
    %cst_21 = arith.constant 4.000000e-01 : f32
    %41 = vector.broadcast %cst_21 : f32 to vector<1x1x2x128xf32>
    %42 = arith.mulf %41, %40 : vector<1x1x2x128xf32>
    %43 = arith.addf %26, %42 : vector<1x1x2x128xf32>
    %c0_22 = arith.constant 0 : index
    %c0_23 = arith.constant 0 : index
    %c0_24 = arith.constant 0 : index
    %c0_25 = arith.constant 0 : index
    %44 = vector.load %arg6[%c0_22, %c0_23, %c0_24, %c0_25] : memref<1x4x2x128xf32, #tpu.memory_space<vmem>>, vector<1x4x2x128xf32>
    %cst_26 = arith.constant dense<0xFF800000> : vector<1x2x128xf32>
    %45 = vector.multi_reduction <maximumf>, %44, %cst_26 [1] : vector<1x4x2x128xf32> to vector<1x2x128xf32>
    %46 = vector.shape_cast %45 : vector<1x2x128xf32> to vector<1x1x2x128xf32>
    %47 = vector.broadcast %46 : vector<1x1x2x128xf32> to vector<1x4x2x128xf32>
    %48 = arith.subf %44, %47 : vector<1x4x2x128xf32>
    %49 = math.exp %48 : vector<1x4x2x128xf32>
    %cst_27 = arith.constant dense<0.000000e+00> : vector<1x2x128xf32>
    %50 = vector.multi_reduction <add>, %49, %cst_27 [1] : vector<1x4x2x128xf32> to vector<1x2x128xf32>
    %51 = vector.shape_cast %50 : vector<1x2x128xf32> to vector<1x1x2x128xf32>
    %52 = math.log %51 : vector<1x1x2x128xf32>
    %cst_28 = arith.constant 0.000000e+00 : f32
    %53 = vector.broadcast %cst_28 : f32 to vector<1x4x2x128xf32>
    %54 = arith.select %8, %48, %53 : vector<1x4x2x128xi1>, vector<1x4x2x128xf32>
    %cst_29 = arith.constant dense<0.000000e+00> : vector<1x2x128xf32>
    %55 = vector.multi_reduction <add>, %54, %cst_29 [1] : vector<1x4x2x128xf32> to vector<1x2x128xf32>
    %56 = vector.shape_cast %55 : vector<1x2x128xf32> to vector<1x1x2x128xf32>
    %57 = arith.subf %52, %56 : vector<1x1x2x128xf32>
    %cst_30 = arith.constant 4.000000e-01 : f32
    %58 = vector.broadcast %cst_30 : f32 to vector<1x1x2x128xf32>
    %59 = arith.mulf %58, %57 : vector<1x1x2x128xf32>
    %60 = arith.addf %43, %59 : vector<1x1x2x128xf32>
    %cst_31 = arith.constant 0.000000e+00 : f32
    %61 = vector.broadcast %cst_31 : f32 to vector<1x1x2x128xf32>
    %62 = arith.select %5, %60, %61 : vector<1x1x2x128xi1>, vector<1x1x2x128xf32>
    %c0_32 = arith.constant 0 : index
    %c0_33 = arith.constant 0 : index
    %63 = vector.load %arg9[%c0_32, %c0_33] : memref<2x128xf32, #tpu.memory_space<vmem>>, vector<2x128xf32>
    %64 = vector.shape_cast %62 : vector<1x1x2x128xf32> to vector<2x128xf32>
    %65 = arith.addf %63, %64 : vector<2x128xf32>
    %c0_34 = arith.constant 0 : index
    %c0_35 = arith.constant 0 : index
    %66 = vector.load %arg9[%c0_34, %c0_35] : memref<2x128xf32, #tpu.memory_space<vmem>>, vector<2x128xf32>
    tpu.vector_store %arg9[%c0_34, %c0_35], %65 {strides = array<i32>} : memref<2x128xf32, #tpu.memory_space<vmem>>, vector<2x128xf32>,
    %c0_36 = arith.constant 0 : index
    %c0_37 = arith.constant 0 : index
    %67 = vector.load %arg10[%c0_36, %c0_37] : memref<2x128xf32, #tpu.memory_space<vmem>>, vector<2x128xf32>
    %68 = vector.shape_cast %5 : vector<1x1x2x128xi1> to vector<2x128xi1>
    %69 = arith.extui %68 : vector<2x128xi1> to vector<2x128xi32>
    %70 = arith.sitofp %69 : vector<2x128xi32> to vector<2x128xf32>
    %71 = arith.addf %67, %70 : vector<2x128xf32>
    %c0_38 = arith.constant 0 : index
    %c0_39 = arith.constant 0 : index
    %72 = vector.load %arg10[%c0_38, %c0_39] : memref<2x128xf32, #tpu.memory_space<vmem>>, vector<2x128xf32>
    tpu.vector_store %arg10[%c0_38, %c0_39], %71 {strides = array<i32>} : memref<2x128xf32, #tpu.memory_space<vmem>>, vector<2x128xf32>,
    %c0_i32_40 = arith.constant 0 : i32
    %73 = arith.cmpi eq, %arg2, %c0_i32_40 : i32
    %74 = arith.extui %73 : i1 to i32
    %c0_i32_41 = arith.constant 0 : i32
    %75 = arith.cmpi ne, %74, %c0_i32_41 : i32
    scf.if %75 {
      %c0_42 = arith.constant 0 : index
      %c0_43 = arith.constant 0 : index
      %76 = vector.load %arg9[%c0_42, %c0_43] : memref<2x128xf32, #tpu.memory_space<vmem>>, vector<2x128xf32>
      %77 = vector.shape_cast %76 : vector<2x128xf32> to vector<1x2x128xf32>
      %cst_44 = arith.constant dense<0.000000e+00> : vector<1xf32>
      %78 = vector.multi_reduction <add>, %77, %cst_44 [1, 2] : vector<1x2x128xf32> to vector<1xf32>
      %79 = vector.shape_cast %78 : vector<1xf32> to vector<1x1x1xf32>
      %80 = vector.extract %79[0, 0, 0] : f32 from vector<1x1x1xf32>
      %81 = vector.broadcast %80 : f32 to vector<1x1x1x1xf32>
      %c0_45 = arith.constant 0 : index
      %c0_46 = arith.constant 0 : index
      %c0_47 = arith.constant 0 : index
      %c0_48 = arith.constant 0 : index
      %82 = vector.load %arg7[%c0_45, %c0_46, %c0_47, %c0_48] : memref<1x1x1x1xf32, #tpu.memory_space<vmem>>, vector<1x1x1x1xf32>
      tpu.vector_store %arg7[%c0_45, %c0_46, %c0_47, %c0_48], %81 {strides = array<i32>} : memref<1x1x1x1xf32, #tpu.memory_space<vmem>>, vector<1x1x1x1xf32>,
      %c0_49 = arith.constant 0 : index
      %c0_50 = arith.constant 0 : index
      %83 = vector.load %arg10[%c0_49, %c0_50] : memref<2x128xf32, #tpu.memory_space<vmem>>, vector<2x128xf32>
      %84 = vector.shape_cast %83 : vector<2x128xf32> to vector<1x2x128xf32>
      %cst_51 = arith.constant dense<0.000000e+00> : vector<1xf32>
      %85 = vector.multi_reduction <add>, %84, %cst_51 [1, 2] : vector<1x2x128xf32> to vector<1xf32>
      %86 = vector.shape_cast %85 : vector<1xf32> to vector<1x1x1xf32>
      %87 = vector.extract %86[0, 0, 0] : f32 from vector<1x1x1xf32>
      %88 = vector.broadcast %87 : f32 to vector<1x1x1x1xf32>
      %c0_52 = arith.constant 0 : index
      %c0_53 = arith.constant 0 : index
      %c0_54 = arith.constant 0 : index
      %c0_55 = arith.constant 0 : index
      %89 = vector.load %arg8[%c0_52, %c0_53, %c0_54, %c0_55] : memref<1x1x1x1xf32, #tpu.memory_space<vmem>>, vector<1x1x1x1xf32>
      tpu.vector_store %arg8[%c0_52, %c0_53, %c0_54, %c0_55], %88 {strides = array<i32>} : memref<1x1x1x1xf32, #tpu.memory_space<vmem>>, vector<1x1x1x1xf32>,
    } else {
    }
    return
  }
  func.func @transform_0(%arg0: i32, %arg1: i32, %arg2: i32) -> (i32, i32, i32, i32) {
    %c1_i32 = arith.constant 1 : i32
    %0 = arith.muli %arg1, %c1_i32 : i32
    %1 = arith.addi %0, %arg2 : i32
    %c0_i32 = arith.constant 0 : i32
    %c0_i32_0 = arith.constant 0 : i32
    %c0_i32_1 = arith.constant 0 : i32
    return %arg0, %c0_i32, %1, %c0_i32_0 : i32, i32, i32, i32
  }
  func.func @transform_1(%arg0: i32, %arg1: i32, %arg2: i32) -> (i32, i32, i32, i32) {
    %c1_i32 = arith.constant 1 : i32
    %0 = arith.muli %arg1, %c1_i32 : i32
    %1 = arith.addi %0, %arg2 : i32
    %c0_i32 = arith.constant 0 : i32
    %c0_i32_0 = arith.constant 0 : i32
    %c0_i32_1 = arith.constant 0 : i32
    return %arg0, %c0_i32, %1, %c0_i32_0 : i32, i32, i32, i32
  }
  func.func @transform_2(%arg0: i32, %arg1: i32, %arg2: i32) -> (i32, i32, i32, i32) {
    %c1_i32 = arith.constant 1 : i32
    %0 = arith.muli %arg1, %c1_i32 : i32
    %1 = arith.addi %0, %arg2 : i32
    %c0_i32 = arith.constant 0 : i32
    %c0_i32_0 = arith.constant 0 : i32
    %c0_i32_1 = arith.constant 0 : i32
    return %arg0, %c0_i32, %1, %c0_i32_0 : i32, i32, i32, i32
  }
  func.func @transform_3(%arg0: i32, %arg1: i32, %arg2: i32) -> (i32, i32, i32, i32) {
    %c1_i32 = arith.constant 1 : i32
    %0 = arith.muli %arg1, %c1_i32 : i32
    %1 = arith.addi %0, %arg2 : i32
    %c0_i32 = arith.constant 0 : i32
    %c0_i32_0 = arith.constant 0 : i32
    %c0_i32_1 = arith.constant 0 : i32
    return %arg0, %c0_i32, %1, %c0_i32_0 : i32, i32, i32, i32
  }
  func.func @transform_4(%arg0: i32, %arg1: i32, %arg2: i32) -> (i32, i32, i32, i32) {
    %c0_i32 = arith.constant 0 : i32
    %c0_i32_0 = arith.constant 0 : i32
    %c0_i32_1 = arith.constant 0 : i32
    return %arg0, %arg1, %c0_i32, %c0_i32_0 : i32, i32, i32, i32
  }
  func.func @transform_5(%arg0: i32, %arg1: i32, %arg2: i32) -> (i32, i32, i32, i32) {
    %c0_i32 = arith.constant 0 : i32
    %c0_i32_0 = arith.constant 0 : i32
    %c0_i32_1 = arith.constant 0 : i32
    return %arg0, %arg1, %c0_i32, %c0_i32_0 : i32, i32, i32, i32
  }
}

</mosaic_0001>

<bundles_post_ra>
// kernel: tpu_custom_call.1
= control target key start
LH: loop header
LB: loop body
LE: loop exit
PB: predicated region body
PF: predicated region fallthrough
CT: control target
= control target key end

     0   :  { %s1440_s0 = inlined_call_operand.hbm [shape: s32[2,1,2,128], index: 0, kind: input, shape index: {}]   ;;  %s1441_s1 = inlined_call_operand.hbm [shape: f32[2,4,2,128], index: 1, kind: input, shape index: {}]   ;;  %s1442_s2 = inlined_call_operand.hbm [shape: f32[2,4,2,128], index: 2, kind: input, shape index: {}]   ;;  %s1443_s3 = inlined_call_operand.hbm [shape: f32[2,4,2,128], index: 3, kind: input, shape index: {}]   ;;  %s1444_s4 = inlined_call_operand.vmem [shape: f32[2,1,1,1], index: 4, kind: output, shape index: {0}]   ;;  %s1445_s5 = inlined_call_operand.vmem [shape: f32[2,1,1,1], index: 5, kind: output, shape index: {1}]  }
   0x1   :  { %1450 = sst [smem:[#allocation15_spill]] %s1440_s0 }
   0x2   :  { %1451 = sst [smem:[#allocation16_spill]] %s1441_s1 }
   0x3   :  { %11 = vsyncpa [#allocation5], 0 }
   0x4   :  { %13 = vsyncpa [#allocation5 + $0x1], 0 }
   0x5   :  { %14 = vsyncpa [#allocation7], 0 }
   0x6   :  { %16 = vsyncpa [#allocation7 + $0x1], 0 }
   0x7   :  { %17 = vsyncpa [#allocation10], 0 }
   0x8   :  { %19 = vsyncpa [#allocation10 + $0x1], 0  ;;  %s1150_s18 = smov 0   ;;  %s1152_s19 = smov 0  }
   0x9   :  { %s1154_s20 = smov 0   ;;  %s1156_s21 = smov 0  }
   0xa   :  { %s1158_s22 = smov 0   ;;  %s1160_s23 = smov 0  }
   0xb LB: > { %s1446_s24 = sadd.s32 4294967295, %s1111_s23   ;;  %s44_s25 = sadd.s32 1, %s1107_s22  ;;  %s1111_s23 = sphi %s1160_s23, %s25_s23   ;;  %s1107_s22 = sphi %s1158_s22, %s1465_s22   ;;  %s1103_s21 = sphi %s1156_s21, %s1464_s21   ;;  %s1099_s20 = sphi %s1154_s20, %s1463_s20   ;;  %s1095_s19 = sphi %s1152_s19, %s1462_s19   ;;  %s1091_s18 = sphi %s1150_s18, %s1461_s18  }
   0xc   : > { %p46_p0 = scmp.ge.s32.totalorder %s44_s25, 2  ;;  %s55_s26 = sadd.s32 1, %s1099_s20 }
   0xd   : > { %p62_p1 = scmp.ne.s32.totalorder %s1099_s20, %s1095_s19  ;;  %p63_p2 = scmp.eq.s32.totalorder %s1111_s23, 0 }
   0xe   : > { %s1467_s25 = smov (%p46_p0, %s44_s25), 0  ;;  %p68_p4 = scmp.ne.s32.totalorder %s1095_s19, %s1091_s18 }
   0xf   : > { %1452 = sst [smem:[#allocation14_spill]] %s1467_s25  ;;  %p64_p3 = por %p63_p2, %p62_p1 }
  0x10   : > { %s50_s27 = ssub.s32 %s1107_s22, %s1467_s25  ;;  %p69_p5 = scmp.eq.s32.totalorder %s1446_s24, 0 }
  0x11   : > { %p53_p6 = scmp.eq.s32.totalorder %s50_s27, 0  ;;  %p859_p8 = scmp.lt.s32.totalorder %s1111_s23, 2 }
  0x12   : > { %p1191_p7 = por %p69_p5, %p68_p4  ;;  %s1200_s30 = sand.u32 1, %s1099_s20  }
  0x13   : > { %s1197_s29 = scalar_select %p53_p6, %s1099_s20, %s55_s26  }
  0x14   : > { %p1202_p9 = pnand %p859_p8, %p64_p3  ;;  %s258_s7 = sand.u32 1, %s1111_s23  }
  0x15   : > { %s1208_s8 = sshll.u32 %s1200_s30, 3  ;;  %s1211_s9 = sshll.u32 %s1107_s22, 7 }
  0x16   : > { %s1455_s1 = sld [smem:[#allocation16_spill]]  ;;  %s262_s13 = scalar_lea.vmem [#allocation6], %s1208_s8 }
  0x17   : > { %s271_s14 = sshll.u32 %s262_s13, 4  ;;  %p823_p10 = scmp.ge.s32.totalorder %s1111_s23, 1  ;;  %s272_s14 = int_to_ptr.vmem [resolvable:$true] %s271_s14 }
  0x18   : > { %s1219_s15 = scalar_lea.sflag [#allocation7], %s258_s7  ;;  %p943_p11 = pneg %p1202_p9 }
  0x19   : > { %s954_s16 = scalar_lea.vmem %s272_s14, 128  ;;  %s1113_s17 = smov [#allocation6]  }
  0x1a   : > { %p955_p12 = scmp.ne.s32.totalorder %s272_s14, %s954_s16  ;;  %s959_s18 = sshll.u32 %s1113_s17, 4  ;;  %s960_s18 = int_to_ptr.vmem [resolvable:$false] %s959_s18 }
  0x1b   : > { %s961_s26 = scalar_lea.vmem %s960_s18, 256  ;;  %p962_p1 = scmp.lt.s32.totalorder %s272_s14, %s960_s18 }
  0x1c   : > { %s270_s12 = scalar_lea.hbm %s1455_s1, %s1211_s9  ;;  %p957_p13 = pnand %p955_p12, %p943_p11 }
  0x1d   : > { %p963_p2 = scmp.lt.s32.totalorder %s961_s26, %s954_s16 }
  0x1e   : > { %p958_p0 = pneg %p957_p13 }
  0x1f   : > { %p964_p3 = por %p963_p2, %p962_p1 }
  0x21   : > { %p965_p4 = pnand %p964_p3, %p958_p0 }
  0x23   : > { %968 = shalt.err (!%p965_p4)
}
  0x24   : > { %s1448_s27 = smov 32   ;;  %s1115_s7 = smov 2  }
  0x25   : > { %852 = dma.hbm_to_vmem [thread:$0]  (!%p1202_p9), %s270_s12, 128, %s272_s14, %s1219_s15, %s1448_s27, %s1448_s27, %s1115_s7  }
  0x26   : > { %p325_p5 = scmp.lt.s32.totalorder %s1111_s23, 3  ;;  %s812_s11 = sshll.u32 %s1200_s30, 1 }
  0x27   : > { %s813_s13 = sshll.u32 %s1107_s22, 5  ;;  %s1457_s0 = sld [smem:[#allocation15_spill]] }
  0x28   : > { %p1235_p6 = pnand %p823_p10, %p325_p5  ;;  %s242_s26 = scalar_lea.vmem [#allocation4], %s812_s11 }
  0x29   : > { %s251_s24 = sshll.u32 %s242_s26, 4  ;;  %s239_s1 = scalar_lea.sflag [#allocation5], %s1200_s30  ;;  %s252_s24 = int_to_ptr.vmem [resolvable:$true] %s251_s24 }
  0x2a   : > { %s982_s25 = scalar_lea.vmem %s252_s24, 32  ;;  %s1116_s12 = smov [#allocation4]  }
  0x2b   : > { %p983_p8 = scmp.ne.s32.totalorder %s252_s24, %s982_s25  ;;  %s987_s14 = sshll.u32 %s1116_s12, 4  ;;  %s988_s14 = int_to_ptr.vmem [resolvable:$false] %s987_s14 }
  0x2c   : > { %s989_s27 = scalar_lea.vmem %s988_s14, 64  ;;  %p990_p10 = scmp.lt.s32.totalorder %s252_s24, %s988_s14 }
  0x2d   : > { %s249_s18 = scalar_lea.hbm %s1457_s0, %s813_s13  ;;  %p985_p12 = pnand %p983_p8, %p943_p11 }
  0x2e   : > { %p991_p0 = scmp.lt.s32.totalorder %s989_s27, %s982_s25 }
  0x2f   : > { %p986_p13 = pneg %p985_p12 }
  0x30   : > { %p992_p1 = por %p991_p0, %p990_p10 }
  0x32   : > { %p993_p2 = pnand %p992_p1, %p986_p13 }
  0x34   : > { %996 = shalt.err (!%p993_p2)
}
  0x35   : > { %849 = dma.hbm_to_vmem [thread:$0]  (!%p1202_p9), %s249_s18, 32, %s252_s24, %s239_s1  }
  0x36   : > { %s293_s16 = scalar_lea.hbm %s1442_s2, %s1211_s9  ;;  %s285_s17 = scalar_lea.vmem [#allocation8], %s1208_s8 }
  0x37   : > { %s294_s26 = sshll.u32 %s285_s17, 4  ;;  %s1117_s25 = smov [#allocation8]   ;;  %s295_s26 = int_to_ptr.vmem [resolvable:$true] %s294_s26 }
  0x38   : > { %s1010_s12 = scalar_lea.vmem %s295_s26, 128  ;;  %s1015_s27 = sshll.u32 %s1117_s25, 4  ;;  %s1016_s27 = int_to_ptr.vmem [resolvable:$false] %s1015_s27 }
  0x39   : > { %p1011_p3 = scmp.ne.s32.totalorder %s295_s26, %s1010_s12  ;;  %s1017_s14 = scalar_lea.vmem %s1016_s27, 256 }
  0x3a   : > { %p1018_p8 = scmp.lt.s32.totalorder %s295_s26, %s1016_s27  ;;  %p1019_p12 = scmp.lt.s32.totalorder %s1017_s14, %s1010_s12 }
  0x3b   : > { %p1013_p4 = pnand %p1011_p3, %p943_p11 }
  0x3c   : > { %p1020_p13 = por %p1019_p12, %p1018_p8 }
  0x3d   : > { %p1014_p5 = pneg %p1013_p4 }
  0x3f   : > { %p1021_p10 = pnand %p1020_p13, %p1014_p5 }
  0x41   : > { %1024 = shalt.err (!%p1021_p10)
}
  0x42   : > { %s1458_s1 = smov 32   ;;  %s316_s11 = scalar_lea.hbm %s1443_s3, %s1211_s9 }
  0x43   : > { %855 = dma.hbm_to_vmem [thread:$0]  (!%p1202_p9), %s293_s16, 128, %s295_s26, %s1219_s15, %s1458_s1, %s1458_s1, %s1115_s7  }
  0x44   : > { %s308_s13 = scalar_lea.vmem [#allocation9], %s1208_s8  ;;  %s305_s12 = scalar_lea.sflag [#allocation10], %s1200_s30 }
  0x45   : > { %s317_s17 = sshll.u32 %s308_s13, 4  ;;  %s1118_s27 = smov [#allocation9]   ;;  %s318_s17 = int_to_ptr.vmem [resolvable:$true] %s317_s17 }
  0x46   : > { %s1038_s25 = scalar_lea.vmem %s318_s17, 128  ;;  %s1043_s14 = sshll.u32 %s1118_s27, 4  ;;  %s1044_s14 = int_to_ptr.vmem [resolvable:$false] %s1043_s14 }
  0x47   : > { %p1039_p0 = scmp.ne.s32.totalorder %s318_s17, %s1038_s25  ;;  %s1045_s0 = scalar_lea.vmem %s1044_s14, 256 }
  0x48   : > { %p1046_p3 = scmp.lt.s32.totalorder %s318_s17, %s1044_s14  ;;  %p1047_p4 = scmp.lt.s32.totalorder %s1045_s0, %s1038_s25 }
  0x49   : > { %p1041_p1 = pnand %p1039_p0, %p943_p11 }
  0x4a   : > { %p1048_p5 = por %p1047_p4, %p1046_p3 }
  0x4b   : > { %p1042_p2 = pneg %p1041_p1 }
  0x4d   : > { %p1049_p8 = pnand %p1048_p5, %p1042_p2 }
  0x4f   : > { %1052 = shalt.err (!%p1049_p8)
}
  0x50   : > { %858 = dma.hbm_to_vmem [thread:$0]  (!%p1202_p9), %s316_s11, 128, %s318_s17, %s305_s12, %s1458_s1, %s1458_s1, %s1115_s7  }
  0x51   : > { %329 = sbr.rel (%p1235_p6) target bundleno = 376 (0x178), region = 36  ;;  %s331_s30 = sand.u32 (!%p1235_p6), 1, %s1095_s19  }
  0x52   : > { %s824_s8 = sshll.u32 (!%p1235_p6), %s331_s30, 1  ;;  %s332_s9 = scalar_lea.sflag (!%p1235_p6), [#allocation5], %s331_s30 }
  0x53   : > { %s335_s15 = scalar_lea.vmem (!%p1235_p6), [#allocation4], %s824_s8 }
  0x56   : > { %1078 = dma.done.wait (%p1191_p7), %s332_s9, 32  }
  0x57   : > { %1080 = vsyncadd (%p1191_p7), %s332_s9, 4294967264  ;;  %s1459_s0 = sadd.s32 4294967295, %s1111_s23   ;;  %s825_s16 = sshll.u32 %s331_s30, 3 }
  0x58   : > { %s340_s6 = sand.u32 1, %s1459_s0   ;;  %s344_s26 = scalar_lea.vmem [#allocation6], %s825_s16 }
  0x59   : > { %s341_s7 = scalar_lea.sflag [#allocation7], %s340_s6 }
  0x5a   : > { %1082 = dma.done.wait (%p1191_p7), %s341_s7, 256  }
  0x5b   : > { %1084 = vsyncadd (%p1191_p7), %s341_s7, 4294967040  ;;  %s353_s10 = scalar_lea.vmem [#allocation8], %s825_s16  ;;  %s359_s1 = scalar_lea.sflag [#allocation10], %s331_s30 }
  0x5c   : > { %s1291_s24 = scalar_lea.vmem [#allocation9], %s825_s16 }
  0x5d   : > { %1086 = dma.done.wait (%p1191_p7), %s359_s1, 128  }
  0x5e   : > { %1088 = vsyncadd (%p1191_p7), %s359_s1, 4294967168  ;;  %v1119_v0 = vmov 0.0   ;;  %v439_v1 = vld [vmem:[%s344_s26] sm:$0x3]  ;;  %v440_v2 = vld [vmem:[%s344_s26 + $0x2] sm:$0x3] }
  0x5f   : > { %431 = vst [vmem:[#allocation2] sm:$0x3] %v1119_v0  ;;  %432 = vst [vmem:[#allocation3] sm:$0x3] %v1119_v0  ;;  %v1297_v3 = vld [vmem:[%s335_s15] sm:$0x3] }
  0x60   : > { %v441_v4 = vld [vmem:[%s344_s26 + $0x4] sm:$0x3]  ;;  %vm443_vm0 = vcmask 1041408   ;;  %v442_v5 = vld [vmem:[%s344_s26 + $0x6] sm:$0x3]  ;;  %vm434_vm1 = vcmp.ne.s32.totalorder %v1297_v3, 255 }
  0x61   : > { %v444_v6 = vsel %vm443_vm0, %v439_v1, -inf  ;;  %v445_v7 = vsel %vm443_vm0, %v440_v2, -inf  ;;  %v446_v8 = vsel %vm443_vm0, %v441_v4, -inf  ;;  %v447_v9 = vsel %vm443_vm0, %v442_v5, -inf  ;;  %v485_v11 = vld [vmem:[%s353_s10] sm:$0x3] }
  0x62   : > { %v448_v10 = vmax.f32 %v444_v6, %v445_v7  ;;  %v486_v12 = vld [vmem:[%s353_s10 + $0x2] sm:$0x3]  ;;  %v449_v13 = vmax.f32 %v446_v8, %v447_v9  ;;  %v487_v14 = vld [vmem:[%s353_s10 + $0x4] sm:$0x3]  ;;  %v488_v15 = vld [vmem:[%s353_s10 + $0x6] sm:$0x3] }
  0x63   : > { %v489_v16 = vsel %vm443_vm0, %v485_v11, -inf  ;;  %v490_v17 = vsel %vm443_vm0, %v486_v12, -inf  ;;  %v491_v18 = vsel %vm443_vm0, %v487_v14, -inf  ;;  %v492_v19 = vsel %vm443_vm0, %v488_v15, -inf  ;;  %v531_v20 = vld [vmem:[%s1291_s24] sm:$0x3] }
  0x64   : > { %v828_v21 = vsel %vm434_vm1, 1.0, %v1119_v0  ;;  %v450_v22 = vmax.f32 %v448_v10, %v449_v13  ;;  %v493_v23 = vmax.f32 %v489_v16, %v490_v17  ;;  %v494_v24 = vmax.f32 %v491_v18, %v492_v19  ;;  %v532_v25 = vld [vmem:[%s1291_s24 + $0x2] sm:$0x3]  ;;  %v533_v26 = vld [vmem:[%s1291_s24 + $0x4] sm:$0x3]  ;;  %p415_p7 = scmp.lt.s32.totalorder %s1103_s21, 1 }
  0x65   : > { %v534_v27 = vld [vmem:[%s1291_s24 + $0x6] sm:$0x3]  ;;  %v535_v28 = vsel %vm443_vm0, %v531_v20, -inf  ;;  %v536_v34 = vsel %vm443_vm0, %v532_v25, -inf  ;;  %v537_v35 = vsel %vm443_vm0, %v533_v26, -inf  ;;  %vm435_vm2 = vcmp.eq.s32.totalorder %v1297_v3, 0 }
  0x66   : > { %v581_v29 = vld [vmem:[#allocation3] sm:$0x3]  ;;  %v1315_v30 = vsub.f32 %v439_v1, %v450_v22  ;;  %v1317_v31 = vsub.f32 %v440_v2, %v450_v22  ;;  %v1319_v32 = vsub.f32 %v441_v4, %v450_v22  ;;  %v1321_v33 = vsub.f32 %v442_v5, %v450_v22  ;;  %s1469_s21 = smov (!%p415_p7, %s1103_s21), 1 }
  0x67   : > { %v538_v36 = vsel %vm443_vm0, %v534_v27, -inf  ;;  %v584_v37 = vadd.f32 %v828_v21, %v581_v29  ;;  %v495_v41 = vmax.f32 %v493_v23, %v494_v24  ;;  %v539_v43 = vmax.f32 %v535_v28, %v536_v34  ;;  %s420_s11 = scalar_lea.vmem %s1444_s4, %s1469_s21  ;;  %s426_s25 = scalar_lea.vmem %s1445_s5, %s1469_s21 }
  0x68   : > { %v455_v38 = vmul.f32 1.442695, %v1315_v30  ;;  %v457_v39 = vmul.f32 1.442695, %v1317_v31  ;;  %v459_v40 = vmul.f32 1.442695, %v1319_v32  ;;  %v540_v44 = vmax.f32 %v537_v35, %v538_v36 }
  0x69   : > { %v461_v42 = vmul.f32 1.442695, %v1321_v33  ;;  %585 = vst [vmem:[#allocation3] sm:$0x3] %v584_v37  ;;  %v496_v45 = vsub.f32 %v485_v11, %v495_v41  ;;  %v497_v46 = vsub.f32 %v486_v12, %v495_v41  ;;  %v1330_v47 = vsub.f32 %v487_v14, %v495_v41 }
  0x6a   : > { %911 = vpow2.f32 %v455_v38  ;;  %v1332_v48 = vsub.f32 %v488_v15, %v495_v41  ;;  %v541_v52 = vmax.f32 %v539_v43, %v540_v44  ;;  %vm436_vm3 = vcmp.eq.s32.totalorder %v1297_v3, 1 }
  0x6b   : > { %913 = vpow2.f32 %v457_v39  ;;  %v500_v49 = vmul.f32 1.442695, %v496_v45  ;;  %v502_v50 = vmul.f32 1.442695, %v497_v46  ;;  %v504_v51 = vmul.f32 1.442695, %v1330_v47 }
  0x6c   : > { %915 = vpow2.f32 %v459_v40  ;;  %v506_v53 = vmul.f32 1.442695, %v1332_v48  ;;  %v1336_v54 = vsub.f32 %v531_v20, %v541_v52  ;;  %v1338_v55 = vsub.f32 %v532_v25, %v541_v52 }
  0x6d   : > { %917 = vpow2.f32 %v461_v42  ;;  %v1340_v56 = vsub.f32 %v533_v26, %v541_v52  ;;  %v1342_v57 = vsub.f32 %v534_v27, %v541_v52  ;;  %v517_v21 = vsel %vm435_vm2, %v496_v45, 0.0 }
  0x6e   : > { %919 = vpow2.f32 %v500_v49  ;;  %v546_v58 = vmul.f32 1.442695, %v1336_v54  ;;  %v548_v59 = vmul.f32 1.442695, %v1338_v55  ;;  %v518_v24 = vsel %vm436_vm3, %v497_v46, 0.0 }
  0x6f   : > { %921 = vpow2.f32 %v502_v50  ;;  %v550_v60 = vmul.f32 1.442695, %v1340_v56  ;;  %v552_v61 = vmul.f32 1.442695, %v1342_v57  ;;  %vm437_vm4 = vcmp.eq.s32.totalorder %v1297_v3, 2 }
  0x70   : > { %923 = vpow2.f32 %v504_v51  ;;  %v472_v27 = vsel %vm435_vm2, %v1315_v30, 0.0  ;;  %v473_v34 = vsel %vm436_vm3, %v1317_v31, 0.0  ;;  %v521_v37 = vsel %vm443_vm0, %v517_v21, 0.0 }
  0x71   : > { %925 = vpow2.f32 %v506_v53  ;;  %v522_v38 = vsel %vm443_vm0, %v518_v24, 0.0  ;;  %v519_v30 = vsel %vm437_vm4, %v1330_v47, 0.0  ;;  %vm438_vm5 = vcmp.eq.s32.totalorder %v1297_v3, 3 }
  0x72   : > { %927 = vpow2.f32 %v546_v58  ;;  %v474_v31 = vsel %vm437_vm4, %v1319_v32, 0.0  ;;  %v476_v41 = vsel %vm443_vm0, %v472_v27, 0.0  ;;  %v477_v42 = vsel %vm443_vm0, %v473_v34, 0.0 }
  0x73   : > { %929 = vpow2.f32 %v548_v59  ;;  %v523_v43 = vadd.f32 %v522_v38, %v521_v37  ;;  %v563_v45 = vsel %vm435_vm2, %v1336_v54, 0.0  ;;  %v564_v46 = vsel %vm436_vm3, %v1338_v55, 0.0 }
  0x74   : > { %931 = vpow2.f32 %v550_v60  ;;  %v524_v47 = vsel %vm443_vm0, %v519_v30, 0.0  ;;  %v478_v49 = vadd.f32 %v477_v42, %v476_v41  ;;  %v520_v32 = vsel %vm438_vm5, %v1332_v48, 0.0 }
  0x75   : > { %933 = vpow2.f32 %v552_v61  ;;  %v479_v50 = vsel %vm443_vm0, %v474_v31, 0.0  ;;  %v567_v51 = vsel %vm443_vm0, %v563_v45, 0.0  ;;  %v568_v52 = vsel %vm443_vm0, %v564_v46, 0.0 }
  0x76   : > { %v475_v53 = vsel %vm438_vm5, %v1321_v33, 0.0  ;;  %v525_v54 = vadd.f32 %v524_v47, %v523_v43  ;;  %v565_v55 = vsel %vm437_vm4, %v1340_v56, 0.0  ;;  %v526_v58 = vsel %vm443_vm0, %v520_v32, 0.0 }
  0x77   : > { %v912_v62 = vpop.eup %911  ;;  %v480_v59 = vadd.f32 %v479_v50, %v478_v49  ;;  %v569_v48 = vadd.f32 %v568_v52, %v567_v51  ;;  %v481_v61 = vsel %vm443_vm0, %v475_v53, 0.0  ;;  %vm601_vm6 = vcmask 0  }
  0x78   : > { %v914_v63 = vpop.eup %913  ;;  %v463_v0 = vsel %vm443_vm0, %v912_v62, 0.0  ;;  %v570_v62 = vsel %vm443_vm0, %v565_v55, 0.0 }
  0x79   : > { %v916_v1 = vpop.eup %915  ;;  %v464_v2 = vsel %vm443_vm0, %v914_v63, 0.0  ;;  %v527_v63 = vadd.f32 %v526_v58, %v525_v54 }
  0x7a   : > { %v918_v4 = vpop.eup %917  ;;  %v465_v5 = vadd.f32 %v464_v2, %v463_v0  ;;  %v466_v6 = vsel %vm443_vm0, %v916_v1, 0.0  ;;  %v566_v0 = vsel %vm438_vm5, %v1342_v57, 0.0  ;;  %v482_v2 = vadd.f32 %v481_v61, %v480_v59 }
  0x7b   : > { %v920_v8 = vpop.eup %919  ;;  %v468_v9 = vsel %vm443_vm0, %v918_v4, 0.0  ;;  %v572_v56 = vsel %vm443_vm0, %v566_v0, 0.0 }
  0x7c   : > { %v467_v7 = vadd.f32 %v466_v6, %v465_v5  ;;  %v922_v10 = vpop.eup %921  ;;  %v508_v11 = vsel %vm443_vm0, %v920_v8, 0.0  ;;  %v571_v5 = vadd.f32 %v570_v62, %v569_v48 }
  0x7d   : > { %v924_v12 = vpop.eup %923  ;;  %v509_v13 = vsel %vm443_vm0, %v922_v10, 0.0 }
  0x7e   : > { %v926_v14 = vpop.eup %925  ;;  %v469_v15 = vadd.f32 %v468_v9, %v467_v7  ;;  %v510_v16 = vadd.f32 %v509_v13, %v508_v11  ;;  %v511_v17 = vsel %vm443_vm0, %v924_v12, 0.0  ;;  %v573_v9 = vadd.f32 %v572_v56, %v571_v5 }
  0x7f   : > { %v513_v18 = vsel %vm443_vm0, %v926_v14, 0.0  ;;  %v928_v20 = vpop.eup %927 }
  0x80   : > { %v512_v19 = vadd.f32 %v511_v17, %v510_v16  ;;  %v930_v22 = vpop.eup %929  ;;  %935 = vlog2.f32 %v469_v15  ;;  %v554_v25 = vsel %vm443_vm0, %v928_v20, 0.0  ;;  %v578_v16 = vld [vmem:[#allocation2] sm:$0x3] }
  0x81   : > { %v932_v26 = vpop.eup %931  ;;  %v555_v28 = vsel %vm443_vm0, %v930_v22, 0.0 }
  0x82   : > { %v514_v23 = vadd.f32 %v513_v18, %v512_v19  ;;  %v934_v29 = vpop.eup %933  ;;  %v556_v35 = vadd.f32 %v555_v28, %v554_v25  ;;  %v557_v36 = vsel %vm443_vm0, %v932_v26, 0.0  ;;  %v603_v19 = vld [vmem:[#allocation3] sm:$0x3] }
  0x83   : > { %v559_v39 = vsel %vm443_vm0, %v934_v29, 0.0  ;;  %v604_v21 = vsel %vm443_vm0, %v603_v19, 0.0 }
  0x84   : > { %937 = vlog2.f32 %v514_v23  ;;  %v558_v40 = vadd.f32 %v557_v36, %v556_v35 }
  0x86   : > { %v560_v44 = vadd.f32 %v559_v39, %v558_v40 }
  0x88   : > { %939 = vlog2.f32 %v560_v44 }
  0x8d   : > { %v936_v60 = vpop.eup %935 }
  0x8e   : > { %v471_v1 = vmul.f32 0.6931472, %v936_v60 }
  0x90   : > { %v483_v7 = vsub.f32 %v471_v1, %v482_v2 }
  0x91   : > { %v938_v33 = vpop.eup %937 }
  0x92   : > { %v516_v4 = vmul.f32 0.6931472, %v938_v33 }
  0x94   : > { %v528_v6 = vsub.f32 %v516_v4, %v527_v63 }
  0x95   : > { %v940_v10 = vpop.eup %939 }
  0x96   : > { %v529_v8 = vmul.f32 0.4, %v528_v6  ;;  %v562_v11 = vmul.f32 0.6931472, %v940_v10 }
  0x98   : > { %v530_v12 = vadd.f32 %v529_v8, %v483_v7  ;;  %v574_v13 = vsub.f32 %v562_v11, %v573_v9 }
  0x9a   : > { %v575_v14 = vmul.f32 0.4, %v574_v13 }
  0x9c   : > { %v576_v15 = vadd.f32 %v575_v14, %v530_v12 }
  0x9e   : > { %v577_v57 = vsel %vm434_vm1, %v576_v15, 0.0 }
  0x9f   : > { %v579_v17 = vadd.f32 %v578_v16, %v577_v57 }
  0xa1   : > { %580 = vst [vmem:[#allocation2] sm:$0x3] %v579_v17 }
  0xa8   : > { %v589_v18 = vld [vmem:[#allocation2] sm:$0x3] }
  0xa9   : > { %v590_v20 = vsel %vm443_vm0, %v589_v18, 0.0 }
  0xaa   : > { %591 = vadd.xlane.f32.xlu0 %v590_v20 }
  0xae   : > { %605 = vadd.xlane.f32.xlu0 %v604_v21 }
 0x133   : > { %v592_v22 = vpop.xlane.xlu0 %591 }
 0x134   : > { %v593_v23 = vrot.slane %v592_v22, 4 }
 0x136   : > { %v594_v24 = vadd.f32 %v593_v23, %v592_v22 }
 0x137   : > { %v606_v25 = vpop.xlane.xlu0 %605 }
 0x138   : > { %v595_v26 = vrot.slane %v594_v24, 2  ;;  %v607_v27 = vrot.slane %v606_v25, 4 }
 0x13a   : > { %v608_v3 = vadd.f32 %v607_v27, %v606_v25  ;;  %v596_v28 = vadd.f32 %v595_v26, %v594_v24 }
 0x13c   : > { %v609_v29 = vrot.slane %v608_v3, 2  ;;  %v597_v34 = vrot.slane %v596_v28, 1 }
 0x13e   : > { %v610_v35 = vadd.f32 %v609_v29, %v608_v3  ;;  %v598_v36 = vadd.f32 %v597_v34, %v596_v28 }
 0x140   : > { %834 = vpush %v598_v36  ;;  %v611_v37 = vrot.slane %v610_v35, 1 }
 0x142   : > { %v612_v38 = vadd.f32 %v611_v37, %v610_v35 }
 0x144   : > { %836 = vpush %v612_v38 }
 0x171   : > { %s835_s13 = spop %834 }
 0x172   : > { %v600_v39 = vstv %s835_s13 }
 0x173   : > { %602 = vst.msk [vmem:[%s420_s11] sm:$0x1] %vm601_vm6, %v600_v39 }
 0x175   : > { %s837_s27 = spop %836 }
 0x176   : > { %v614_v30 = vstv %s837_s27 }
 0x177   : > { %615 = vst.msk [vmem:[%s426_s25] sm:$0x1] %vm601_vm6, %v614_v30 }
 0x178 PF: > { %s25_s23 = sadd.s32 1, %s1111_s23   ;;  %s1460_s14 = sld [smem:[#allocation14_spill]] }
 0x179   : > { %p22_p9 = scmp.ge.s32.totalorder %s25_s23, 4   ;;  %s1461_s18 = smov %s1095_s19 }
 0x17a   : > { %s1462_s19 = smov %s1099_s20  ;;  %s1463_s20 = smov %s1197_s29 }
 0x17b   : > { %s1464_s21 = smov %s1107_s22  ;;  %24 = sbr.rel (!%p22_p9) target bundleno = 11 (0xb), region = 133 }
 0x17e   : > { %s1465_s22 = smov %s1460_s14 }
 0x180   :  { %657 = vsyncpa [#allocation5], 1 }
 0x181   :  { %659 = vsyncpa [#allocation5 + $0x1], 1 }
 0x182   :  { %660 = vsyncpa [#allocation7], 1 }
 0x183   :  { %662 = vsyncpa [#allocation7 + $0x1], 1 }
 0x184   :  { %663 = vsyncpa [#allocation10], 1 }
 0x185   :  { %665 = vsyncpa [#allocation10 + $0x1], 1 }

</bundles_post_ra>
